<compile_context>
chip_gen: v6e
topology: v6e:2x2x1
jax: 0.10.0
libtpu: 0.0.40
codegen_flags: <defaults>
</compile_context>

<pallas_src>
import numpy as np

import jax
import jax.numpy as jnp
from jax.experimental import pallas as pl
from jax.experimental.pallas import tpu as pltpu

_LANES = 128


# ----------------------------------------------------------------------------
# Stateless counter-based Gaussian sampler.
# Shared by the Pallas kernel and the tiny plain-jnp remainder path, so the
# noise field is identical regardless of tiling / alignment.
# ----------------------------------------------------------------------------
def _uniform_from_index(idx_u32, seed_u32):
    """Hash (flat element index, seed) -> uniform in (0, 1).

    Two vector u32 multiplies total (trimmed by one round vs. murmur3
    finalizer, per review: int32 multiplies are expensive on the VPU)."""
    h = idx_u32 * jnp.uint32(0x9E3779B9) + seed_u32 * jnp.uint32(0x85EBCA6B)
    h = h ^ (h >> 16)
    h = h * jnp.uint32(0x7FEB352D)
    h = h ^ (h >> 15)
    bits = (h >> 8).astype(jnp.int32)                 # top 24 bits, exact in f32
    return (bits.astype(jnp.float32) + 0.5) * jnp.float32(1.0 / 16777216.0)


def _std_normal_from_uniform(u):
    """z = sqrt(2) * erfinv(2u - 1) via Giles' single-precision approximation.

    No divisions (unlike Acklam); log and sqrt land on the EUP slot.  Both
    branches are polynomial-only; we KEEP the tail branch so the distribution
    beyond |z| ~ 2 is correct (review correctness concern)."""
    x = 2.0 * u - 1.0
    w = -jnp.log((1.0 - x) * (1.0 + x))

    # Central branch (w < 5): covers ~99.7% of samples.
    wc = w - 2.5
    p = jnp.float32(2.81022636e-08)
    p = 3.43273939e-07 + p * wc
    p = -3.5233877e-06 + p * wc
    p = -4.39150654e-06 + p * wc
    p = 0.00021858087 + p * wc
    p = -0.00125372503 + p * wc
    p = -0.00417768164 + p * wc
    p = 0.246640727 + p * wc
    p_central = 1.50140941 + p * wc

    # Tail branch (w >= 5).
    wt = jnp.sqrt(w) - 3.0
    q = jnp.float32(-0.000200214257)
    q = 0.000100950558 + q * wt
    q = 0.00134934322 + q * wt
    q = -0.00367342844 + q * wt
    q = 0.00573950773 + q * wt
    q = -0.0076224613 + q * wt
    q = 0.00943887047 + q * wt
    q = 1.00167406 + q * wt
    q_tail = 2.83297682 + q * wt

    erfinv_x = jnp.where(w < 5.0, p_central, q_tail) * x
    return jnp.float32(1.4142135623730951) * erfinv_x


def _std_normal(idx_u32, seed_u32):
    return _std_normal_from_uniform(_uniform_from_index(idx_u32, seed_u32))


# ----------------------------------------------------------------------------
# Pallas kernel
# ----------------------------------------------------------------------------
def _gaussian_noise_kernel(seed_ref, sigma_ref, x_ref, o_ref):
    tile_rows, lanes = x_ref.shape
    row0 = pl.program_id(0) * tile_rows
    rows = jax.lax.broadcasted_iota(jnp.int32, (tile_rows, lanes), 0) + row0
    cols = jax.lax.broadcasted_iota(jnp.int32, (tile_rows, lanes), 1)
    # Global flat element index (wrapping 32-bit arithmetic is fine: hash input).
    idx = (rows * lanes + cols).astype(jnp.uint32)

    z = _std_normal(idx, seed_ref[0].astype(jnp.uint32))
    sigma = sigma_ref[0]
    o_ref[...] = (x_ref[...].astype(jnp.float32) + sigma * z).astype(o_ref.dtype)


def _pick_tile_rows(n_rows, itemsize):
    """Tile rows sized by ELEMENT count (intermediates are all f32), rounded
    to the dtype's sublane packing, and capped so the grid has >=2 steps
    (v7x megacore sharding)."""
    sub = max(8, 32 // int(itemsize))                   # f32:8, bf16:16, int8:32
    target = (1 << 20) // (_LANES * 4)                  # ~1 MiB of f32 elements = 2048 rows
    half = -(-n_rows // 2)                              # cdiv(n_rows, 2)
    half = ((half + sub - 1) // sub) * sub
    rows_up = ((n_rows + sub - 1) // sub) * sub
    return max(sub, int(min(target, half, rows_up)))


def _noise_pallas(x2d, sigma, seed):
    n_rows, lanes = x2d.shape
    itemsize = jnp.dtype(x2d.dtype).itemsize
    tile_rows = _pick_tile_rows(n_rows, itemsize)
    grid = (pl.cdiv(n_rows, tile_rows),)

    # VMEM budget: double-buffered in+out tiles + ~16 live full-tile f32
    # temporaries (iotas/hash/u/w/both polynomials) + small headroom.
    io_tile = tile_rows * lanes * int(itemsize)
    f32_tile = tile_rows * lanes * 4
    vmem_limit = int(4 * io_tile + 16 * f32_tile + (2 << 20))   # ~22 MiB @ f32

    seed_arr = jnp.reshape(seed.astype(jnp.int32), (1,))
    sigma_arr = jnp.reshape(sigma.astype(jnp.float32), (1,))

    return pl.pallas_call(
        _gaussian_noise_kernel,
        out_shape=jax.ShapeDtypeStruct((n_rows, lanes), x2d.dtype),
        grid_spec=pltpu.PrefetchScalarGridSpec(
            num_scalar_prefetch=0,
            grid=grid,
            in_specs=[
                pl.BlockSpec(memory_space=pltpu.MemorySpace.SMEM),     # seed
                pl.BlockSpec(memory_space=pltpu.MemorySpace.SMEM),     # sigma
                pl.BlockSpec((tile_rows, lanes), lambda i: (i, 0)),    # x tile
            ],
            out_specs=pl.BlockSpec((tile_rows, lanes), lambda i: (i, 0)),
        ),
        compiler_params=pltpu.CompilerParams(
            dimension_semantics=("parallel",),   # tiles independent (stateless RNG)
            vmem_limit_bytes=vmem_limit,
        ),
    )(seed_arr, sigma_arr, x2d)


def _gaussian_noise_impl(x, sigma, seed):
    """x: any shape/dtype.  sigma: f32 scalar.  seed: i32 scalar."""
    orig_shape, orig_dtype = x.shape, x.dtype
    total = int(x.size)
    if total == 0:
        return x

    sigma = jnp.asarray(sigma, jnp.float32)
    seed = jnp.asarray(seed, jnp.int32)

    flat = x.reshape((total,))
    n_main = (total // _LANES) * _LANES

    out_main = None
    if n_main > 0:
        main = flat if n_main == total else flat[:n_main]
        x2d = main.reshape((n_main // _LANES, _LANES))
        out_main = _noise_pallas(x2d, sigma, seed).reshape((n_main,))
        if n_main == total:
            # Common case: pure reshapes (no pad, no slice, no concat).
            return out_main.reshape(orig_shape)

    # TODO(synk): rare non-128-aligned path — the <128-element remainder runs
    # in plain jnp with the exact same hash->erfinv formula; the concat costs
    # one extra copy of the tensor.
    rem = total - n_main
    idx_tail = (n_main + jnp.arange(rem, dtype=jnp.int32)).astype(jnp.uint32)
    z_tail = _std_normal(idx_tail, seed.astype(jnp.uint32))
    out_tail = (flat[n_main:].astype(jnp.float32) + sigma * z_tail).astype(orig_dtype)
    out = out_tail if out_main is None else jnp.concatenate([out_main, out_tail])
    return out.reshape(orig_shape)


# ----------------------------------------------------------------------------
# custom_vjp: training-mode module must be differentiable through pallas_call.
# Gradient w.r.t. x is identity; sigma gradient is zero (trainable=True is not
# supported, matching the previous version's behavior).
# ----------------------------------------------------------------------------
@jax.custom_vjp
def _gaussian_noise_apply(x, sigma, seed):
    return _gaussian_noise_impl(x, sigma, seed)


def _gaussian_noise_fwd(x, sigma, seed):
    return _gaussian_noise_impl(x, sigma, seed), None


def _gaussian_noise_bwd(_, g):
    # TODO(synk): trainable sigma would need d(out)/dsigma = z (recompute z
    # from the seed in a second pallas pass); returning zero cotangent for now.
    return (g,
            jnp.zeros((), jnp.float32),
            np.zeros((), dtype=jax.dtypes.float0))


_gaussian_noise_apply.defvjp(_gaussian_noise_fwd, _gaussian_noise_bwd)
_gaussian_noise_apply_jit = jax.jit(_gaussian_noise_apply)


class GaussianNoise:
    """JAX/Pallas port of the PyTorch GaussianNoise module (forward pass)."""

    def __init__(self, std=0.1, trainable=False, adapt=False, momentum=0.95, seed=0):
        assert not (trainable and adapt)
        self.std = float(std)
        self.trainable = trainable
        self.adapt = adapt
        self.momentum = float(momentum)
        # nn.Parameter(torch.ones(1) * std)
        self.sigma = jnp.ones((1,), dtype=jnp.float32) * self.std
        self.running_std = jnp.float32(1.0)
        self.training = True
        self._base_seed = int(seed)
        self._step = 0   # fresh noise field every forward call, like torch.randn

    def __call__(self, x, seed=None):
        if (not self.training) or self.std == 0:
            return x

        if self.adapt:
            # TODO(synk): fusing this reduction into the noise kernel is not
            # possible without changing semantics (sigma for THIS call depends
            # on std(x) of THIS call), so it stays a single fused on-device
            # jnp.std pass (no host sync).
            xstd = jnp.std(x.astype(jnp.float32))
            self.running_std = (self.momentum * self.running_std
                                + (1.0 - self.momentum) * xstd)
            self.sigma = jnp.ones((1,), dtype=jnp.float32) * (self.std * self.running_std)

        if seed is None:
            seed = self._base_seed + self._step
        self._step += 1

        # Native-dtype I/O: no wrapper-side casts, no pad/slice on aligned sizes.
        return _gaussian_noise_apply_jit(x, self.sigma[0], jnp.int32(seed))


if __name__ == "__main__":
    key = jax.random.PRNGKey(0)
    # NCHW input, consistent with conv-style usage in the source repo.
    x = jax.random.normal(key, (2, 4, 16, 16), dtype=jnp.float32)

    mod = GaussianNoise(std=0.1)
    mod.training = True
    out = jax.block_until_ready(mod(x, seed=1234))

    assert out.shape == x.shape and out.dtype == x.dtype
    noise = out - x
    nstd = float(jnp.std(noise))
    nmean = float(jnp.mean(noise))
    assert 0.05 < nstd < 0.2, f"unexpected noise std {nstd}"
    assert abs(nmean) < 0.05, f"unexpected noise mean {nmean}"

    # Different seed -> different noise field.
    out2 = jax.block_until_ready(mod(x, seed=4321))
    assert not bool(jnp.all(out2 == out))

    # Fresh noise each forward call when no explicit seed is given.
    a = jax.block_until_ready(mod(x))
    b = jax.block_until_ready(mod(x))
    assert not bool(jnp.all(a == b))

    # Identity gradient w.r.t. x through the custom_vjp.
    g = jax.grad(lambda xx: jnp.sum(
        _gaussian_noise_apply_jit(xx, jnp.float32(0.1), jnp.int32(7))))(x)
    assert bool(jnp.all(g == 1.0))

    # bf16 input path (element-count-based tiling, native-dtype I/O).
    xb = x.astype(jnp.bfloat16)
    outb = jax.block_until_ready(mod(xb, seed=99))
    assert outb.dtype == jnp.bfloat16 and outb.shape == x.shape

    # Non-128-aligned size: kernel on the aligned prefix + jnp remainder.
    xu = jax.random.normal(key, (3, 45), dtype=jnp.float32)    # 135 elements
    outu = jax.block_until_ready(mod(xu, seed=5))
    assert outu.shape == xu.shape and outu.dtype == xu.dtype
    assert not bool(jnp.all(outu == xu))

    # Eval mode is identity.
    mod.training = False
    out_eval = jax.block_until_ready(mod(x))
    assert bool(jnp.all(out_eval == x))

    print("KERNEL_OK")
</pallas_src>

<mosaic_0001>
module attributes {stable_mosaic.version = 11 : i64} {
  func.func @_gaussian_noise_kernel(%arg0: i32, %arg1: memref<1xi32, #tpu.memory_space<smem>>, %arg2: memref<1xf32, #tpu.memory_space<smem>>, %arg3: memref<8x128xf32, #tpu.memory_space<vmem>>, %arg4: memref<8x128xf32, #tpu.memory_space<vmem>>) attributes {dimension_semantics = [#tpu.dimension_semantics<parallel>], iteration_bounds = array<i64: 2>, scalar_prefetch = 0 : i64, scratch_operands = 0 : i64, tpu.core_type = #tpu.core_type<tc>, window_params = [{transform_indices = @transform_0, window_bounds = array<i64: 1>}, {transform_indices = @transform_1, window_bounds = array<i64: 1>}, {transform_indices = @transform_2, window_bounds = array<i64: 8, 128>}, {transform_indices = @transform_3, window_bounds = array<i64: 8, 128>}]} {
    %c8_i32 = arith.constant 8 : i32
    %0 = arith.muli %arg0, %c8_i32 : i32
    %1 = tpu.iota {dimensions = array<i32: 0>} : vector<8x128xi32>
    %2 = vector.broadcast %0 : i32 to vector<8x128xi32>
    %3 = arith.addi %1, %2 : vector<8x128xi32>
    %4 = tpu.iota {dimensions = array<i32: 1>} : vector<8x128xi32>
    %c128_i32 = arith.constant 128 : i32
    %5 = vector.broadcast %c128_i32 : i32 to vector<8x128xi32>
    %6 = arith.muli %3, %5 : vector<8x128xi32>
    %7 = arith.addi %6, %4 : vector<8x128xi32>
    %c0 = arith.constant 0 : index
    %8 = memref.load %arg1[%c0] : memref<1xi32, #tpu.memory_space<smem>>
    %c-1640531527_i32 = arith.constant -1640531527 : i32
    %9 = vector.broadcast %c-1640531527_i32 : i32 to vector<8x128xi32>
    %10 = arith.muli %7, %9 : vector<8x128xi32>
    %c-2048144789_i32 = arith.constant -2048144789 : i32
    %11 = arith.muli %8, %c-2048144789_i32 : i32
    %12 = vector.broadcast %11 : i32 to vector<8x128xi32>
    %13 = arith.addi %10, %12 : vector<8x128xi32>
    %c16_i32 = arith.constant 16 : i32
    %14 = vector.broadcast %c16_i32 : i32 to vector<8x128xi32>
    %15 = arith.shrui %13, %14 : vector<8x128xi32>
    %16 = arith.xori %13, %15 : vector<8x128xi32>
    %c2146121005_i32 = arith.constant 2146121005 : i32
    %17 = vector.broadcast %c2146121005_i32 : i32 to vector<8x128xi32>
    %18 = arith.muli %16, %17 : vector<8x128xi32>
    %c15_i32 = arith.constant 15 : i32
    %19 = vector.broadcast %c15_i32 : i32 to vector<8x128xi32>
    %20 = arith.shrui %18, %19 : vector<8x128xi32>
    %21 = arith.xori %18, %20 : vector<8x128xi32>
    %c8_i32_0 = arith.constant 8 : i32
    %22 = vector.broadcast %c8_i32_0 : i32 to vector<8x128xi32>
    %23 = arith.shrui %21, %22 : vector<8x128xi32>
    %24 = arith.sitofp %23 : vector<8x128xi32> to vector<8x128xf32>
    %cst = arith.constant 5.000000e-01 : f32
    %25 = vector.broadcast %cst : f32 to vector<8x128xf32>
    %26 = arith.addf %24, %25 : vector<8x128xf32>
    %cst_1 = arith.constant 5.96046448E-8 : f32
    %27 = vector.broadcast %cst_1 : f32 to vector<8x128xf32>
    %28 = arith.mulf %26, %27 : vector<8x128xf32>
    %cst_2 = arith.constant 2.000000e+00 : f32
    %29 = vector.broadcast %cst_2 : f32 to vector<8x128xf32>
    %30 = arith.mulf %29, %28 : vector<8x128xf32>
    %cst_3 = arith.constant 1.000000e+00 : f32
    %31 = vector.broadcast %cst_3 : f32 to vector<8x128xf32>
    %32 = arith.subf %30, %31 : vector<8x128xf32>
    %cst_4 = arith.constant 1.000000e+00 : f32
    %33 = vector.broadcast %cst_4 : f32 to vector<8x128xf32>
    %34 = arith.subf %33, %32 : vector<8x128xf32>
    %cst_5 = arith.constant 1.000000e+00 : f32
    %35 = vector.broadcast %cst_5 : f32 to vector<8x128xf32>
    %36 = arith.addf %35, %32 : vector<8x128xf32>
    %37 = arith.mulf %34, %36 : vector<8x128xf32>
    %38 = math.log %37 : vector<8x128xf32>
    %cst_6 = arith.constant 0.000000e+00 : f32
    %39 = vector.broadcast %cst_6 : f32 to vector<8x128xf32>
    %40 = arith.subf %39, %38 : vector<8x128xf32>
    %cst_7 = arith.constant 2.500000e+00 : f32
    %41 = vector.broadcast %cst_7 : f32 to vector<8x128xf32>
    %42 = arith.subf %40, %41 : vector<8x128xf32>
    %cst_8 = arith.constant 2.81022636E-8 : f32
    %43 = vector.broadcast %cst_8 : f32 to vector<8x128xf32>
    %44 = arith.mulf %43, %42 : vector<8x128xf32>
    %cst_9 = arith.constant 3.43273939E-7 : f32
    %45 = vector.broadcast %cst_9 : f32 to vector<8x128xf32>
    %46 = arith.addf %45, %44 : vector<8x128xf32>
    %47 = arith.mulf %46, %42 : vector<8x128xf32>
    %cst_10 = arith.constant -3.5233877E-6 : f32
    %48 = vector.broadcast %cst_10 : f32 to vector<8x128xf32>
    %49 = arith.addf %48, %47 : vector<8x128xf32>
    %50 = arith.mulf %49, %42 : vector<8x128xf32>
    %cst_11 = arith.constant -4.39150654E-6 : f32
    %51 = vector.broadcast %cst_11 : f32 to vector<8x128xf32>
    %52 = arith.addf %51, %50 : vector<8x128xf32>
    %53 = arith.mulf %52, %42 : vector<8x128xf32>
    %cst_12 = arith.constant 2.1858087E-4 : f32
    %54 = vector.broadcast %cst_12 : f32 to vector<8x128xf32>
    %55 = arith.addf %54, %53 : vector<8x128xf32>
    %56 = arith.mulf %55, %42 : vector<8x128xf32>
    %cst_13 = arith.constant -0.00125372503 : f32
    %57 = vector.broadcast %cst_13 : f32 to vector<8x128xf32>
    %58 = arith.addf %57, %56 : vector<8x128xf32>
    %59 = arith.mulf %58, %42 : vector<8x128xf32>
    %cst_14 = arith.constant -0.00417768164 : f32
    %60 = vector.broadcast %cst_14 : f32 to vector<8x128xf32>
    %61 = arith.addf %60, %59 : vector<8x128xf32>
    %62 = arith.mulf %61, %42 : vector<8x128xf32>
    %cst_15 = arith.constant 0.246640727 : f32
    %63 = vector.broadcast %cst_15 : f32 to vector<8x128xf32>
    %64 = arith.addf %63, %62 : vector<8x128xf32>
    %65 = arith.mulf %64, %42 : vector<8x128xf32>
    %cst_16 = arith.constant 1.50140941 : f32
    %66 = vector.broadcast %cst_16 : f32 to vector<8x128xf32>
    %67 = arith.addf %66, %65 : vector<8x128xf32>
    %68 = math.sqrt %40 : vector<8x128xf32>
    %cst_17 = arith.constant 3.000000e+00 : f32
    %69 = vector.broadcast %cst_17 : f32 to vector<8x128xf32>
    %70 = arith.subf %68, %69 : vector<8x128xf32>
    %cst_18 = arith.constant -2.00214257E-4 : f32
    %71 = vector.broadcast %cst_18 : f32 to vector<8x128xf32>
    %72 = arith.mulf %71, %70 : vector<8x128xf32>
    %cst_19 = arith.constant 1.00950558E-4 : f32
    %73 = vector.broadcast %cst_19 : f32 to vector<8x128xf32>
    %74 = arith.addf %73, %72 : vector<8x128xf32>
    %75 = arith.mulf %74, %70 : vector<8x128xf32>
    %cst_20 = arith.constant 0.00134934322 : f32
    %76 = vector.broadcast %cst_20 : f32 to vector<8x128xf32>
    %77 = arith.addf %76, %75 : vector<8x128xf32>
    %78 = arith.mulf %77, %70 : vector<8x128xf32>
    %cst_21 = arith.constant -0.00367342844 : f32
    %79 = vector.broadcast %cst_21 : f32 to vector<8x128xf32>
    %80 = arith.addf %79, %78 : vector<8x128xf32>
    %81 = arith.mulf %80, %70 : vector<8x128xf32>
    %cst_22 = arith.constant 0.00573950773 : f32
    %82 = vector.broadcast %cst_22 : f32 to vector<8x128xf32>
    %83 = arith.addf %82, %81 : vector<8x128xf32>
    %84 = arith.mulf %83, %70 : vector<8x128xf32>
    %cst_23 = arith.constant -0.0076224613 : f32
    %85 = vector.broadcast %cst_23 : f32 to vector<8x128xf32>
    %86 = arith.addf %85, %84 : vector<8x128xf32>
    %87 = arith.mulf %86, %70 : vector<8x128xf32>
    %cst_24 = arith.constant 0.00943887047 : f32
    %88 = vector.broadcast %cst_24 : f32 to vector<8x128xf32>
    %89 = arith.addf %88, %87 : vector<8x128xf32>
    %90 = arith.mulf %89, %70 : vector<8x128xf32>
    %cst_25 = arith.constant 1.00167406 : f32
    %91 = vector.broadcast %cst_25 : f32 to vector<8x128xf32>
    %92 = arith.addf %91, %90 : vector<8x128xf32>
    %93 = arith.mulf %92, %70 : vector<8x128xf32>
    %cst_26 = arith.constant 2.83297682 : f32
    %94 = vector.broadcast %cst_26 : f32 to vector<8x128xf32>
    %95 = arith.addf %94, %93 : vector<8x128xf32>
    %cst_27 = arith.constant 5.000000e+00 : f32
    %96 = vector.broadcast %cst_27 : f32 to vector<8x128xf32>
    %97 = arith.cmpf olt, %40, %96 : vector<8x128xf32>
    %98 = arith.select %97, %67, %95 : vector<8x128xi1>, vector<8x128xf32>
    %99 = arith.mulf %98, %32 : vector<8x128xf32>
    %cst_28 = arith.constant 1.41421354 : f32
    %100 = vector.broadcast %cst_28 : f32 to vector<8x128xf32>
    %101 = arith.mulf %100, %99 : vector<8x128xf32>
    %c0_29 = arith.constant 0 : index
    %102 = memref.load %arg2[%c0_29] : memref<1xf32, #tpu.memory_space<smem>>
    %c0_30 = arith.constant 0 : index
    %c0_31 = arith.constant 0 : index
    %103 = vector.load %arg3[%c0_30, %c0_31] : memref<8x128xf32, #tpu.memory_space<vmem>>, vector<8x128xf32>
    %104 = vector.broadcast %102 : f32 to vector<8x128xf32>
    %105 = arith.mulf %104, %101 : vector<8x128xf32>
    %106 = arith.addf %103, %105 : vector<8x128xf32>
    %c0_32 = arith.constant 0 : index
    %c0_33 = arith.constant 0 : index
    %107 = vector.load %arg4[%c0_32, %c0_33] : memref<8x128xf32, #tpu.memory_space<vmem>>, vector<8x128xf32>
    tpu.vector_store %arg4[%c0_32, %c0_33], %106 {strides = array<i32>} : memref<8x128xf32, #tpu.memory_space<vmem>>, vector<8x128xf32>,
    return
  }
  func.func @transform_0(%arg0: i32) -> i32 {
    %c0_i32 = arith.constant 0 : i32
    %c0_i32_0 = arith.constant 0 : i32
    return %c0_i32 : i32
  }
  func.func @transform_1(%arg0: i32) -> i32 {
    %c0_i32 = arith.constant 0 : i32
    %c0_i32_0 = arith.constant 0 : i32
    return %c0_i32 : i32
  }
  func.func @transform_2(%arg0: i32) -> (i32, i32) {
    %c0_i32 = arith.constant 0 : i32
    %c0_i32_0 = arith.constant 0 : i32
    return %arg0, %c0_i32 : i32, i32
  }
  func.func @transform_3(%arg0: i32) -> (i32, i32) {
    %c0_i32 = arith.constant 0 : i32
    %c0_i32_0 = arith.constant 0 : i32
    return %arg0, %c0_i32 : i32, i32
  }
}

</mosaic_0001>

<bundles_post_ra>
// kernel: _gaussian_noise_apply.1
= control target key start
LH: loop header
LB: loop body
LE: loop exit
PB: predicated region body
PF: predicated region fallthrough
CT: control target
= control target key end

     0   :  { %s362_s16 = smov 0   ;;  %s384_s0 = inlined_call_operand.<no memory space> [shape: s32[1], index: 0, kind: input, shape index: {}]   ;;  %s385_s1 = inlined_call_operand.<no memory space> [shape: f32[1], index: 1, kind: input, shape index: {}]   ;;  %s386_s2 = inlined_call_operand.vmem [shape: f32[16,128], index: 2, kind: input, shape index: {}]   ;;  %s387_s3 = inlined_call_operand.vmem [shape: f32[16,128], index: 3, kind: output, shape index: {}]  }
   0x1   :  { %8 = sst [smem:[#allocation2]] %s384_s0 }
   0x2   :  { %9 = sst [smem:[#allocation3]] %s385_s1 }
   0x3 LB: > { %s368_s17 = sadd.s32 4294967295, %s334_s16   ;;  %p307_p0 = scmp.ge.s32.totalorder %s334_s16, 1  ;;  %s334_s16 = sphi %s362_s16, %s15_s16  }
   0x4   : > { %p138_p1 = scmp.lt.s32.totalorder %s334_s16, 3 }
   0x6   : > { %p139_p2 = pnand %p307_p0, %p138_p1 }
   0x7   : > { %s310_s0 = sshll.u32 (!%p139_p2), %s368_s17, 3  ;;  %s177_s1 = sld [smem:[#allocation2]] (!%p139_p2) }
   0x8   : > { %142 = sbr.rel (%p139_p2) target bundleno = 133 (0x85), region = 32  ;;  %p160_p3 = scmp.lt.s32.totalorder (!%p139_p2), %s368_s17, 1 }
   0x9   : > { %s244_s19 = sld [smem:[#allocation3]] (!%p139_p2) }
   0xd   : > { %v169_v0 = vlaneseq  ;;  %v171_v1 = vstv %s310_s0  ;;  %s179_s18 = smul.u32 2246822507, %s177_s1  ;;  %s389_s17 = smov (!%p160_p3, %s368_s17), 1 }
   0xe   : > { %s308_s20 = sshll.u32 %s389_s17, 3 }
   0xf   : > { %v170_v2 = vshrl.u32 %v169_v0, 7  ;;  %v174_v4 = vand.u32 127, %v169_v0  ;;  %v180_v7 = vstv %s179_s18  ;;  %s163_s23 = scalar_lea.vmem %s386_s2, %s308_s20  ;;  %s167_s26 = scalar_lea.vmem %s387_s3, %s308_s20 }
  0x11   : > { %v172_v3 = vadd.s32 %v171_v1, %v170_v2 }
  0x13   : > { %v175_v5 = vmul.u32 128, %v172_v3 }
  0x15   : > { %v176_v6 = vadd.s32 %v175_v5, %v174_v4  ;;  %v246_v4 = vstv %s244_s19 }
  0x17   : > { %v178_v8 = vmul.u32 2654435769, %v176_v6  ;;  %v245_v6 = vld [vmem:[%s163_s23] sm:$0xff] }
  0x19   : > { %v181_v9 = vadd.s32 %v180_v7, %v178_v8 }
  0x1b   : > { %v182_v10 = vshrl.u32 %v181_v9, 16 }
  0x1d   : > { %v183_v11 = vxor.u32 %v182_v10, %v181_v9 }
  0x1f   : > { %v184_v12 = vmul.u32 2146121005, %v183_v11 }
  0x21   : > { %v185_v13 = vshrl.u32 %v184_v12, 15 }
  0x23   : > { %v186_v14 = vxor.u32 %v185_v13, %v184_v12 }
  0x25   : > { %v187_v15 = vshrl.u32 %v186_v14, 8 }
  0x27   : > { %v188_v16 = vcvt.s32.f32 %v187_v15 }
  0x29   : > { %v189_v17 = vadd.f32 0.5, %v188_v16 }
  0x2b   : > { %v190_v18 = vmul.f32 5.9604645e-08, %v189_v17 }
  0x2d   : > { %v191_v19 = vmul.f32 2.0, %v190_v18 }
  0x2f   : > { %v311_v20 = vadd.f32 -1.0, %v191_v19 }
  0x31   : > { %v193_v21 = vsub.f32 1.0, %v311_v20  ;;  %v194_v22 = vadd.f32 1.0, %v311_v20 }
  0x33   : > { %v195_v23 = vmul.f32 %v194_v22, %v193_v21 }
  0x35   : > { %324 = vlog2.f32 %v195_v23 }
  0x42   : > { %v325_v24 = vpop.eup %324 }
  0x43   : > { %v197_v25 = vmul.f32 0.6931472, %v325_v24 }
  0x45   : > { %v198_v26 = vsub.f32 0.0, %v197_v25 }
  0x47   : > { %v312_v27 = vadd.f32 -2.5, %v198_v26  ;;  %326 = vrsqrt.f32 %v198_v26  ;;  %vm218_vm0 = vcmp.eq.f32.partialorder %v198_v26, inf  ;;  %v221_v35 = vand.u32 2147483648, %v198_v26 }
  0x48   : > { %vm220_vm1 = vcmp.eq.f32.partialorder %v198_v26, 0.0  ;;  %vm240_vm2 = vcmp.lt.f32.partialorder %v198_v26, 5.0 }
  0x49   : > { %v200_v28 = vmul.f32 2.8102264e-08, %v312_v27 }
  0x4b   : > { %v201_v29 = vadd.f32 3.4327394e-07, %v200_v28 }
  0x4d   : > { %v202_v30 = vmul.f32 %v312_v27, %v201_v29 }
  0x4f   : > { %v203_v31 = vadd.f32 -3.5233877e-06, %v202_v30 }
  0x51   : > { %v204_v32 = vmul.f32 %v312_v27, %v203_v31 }
  0x53   : > { %v205_v33 = vadd.f32 -4.3915065e-06, %v204_v32 }
  0x54   : > { %v327_v34 = vpop.eup %326 }
  0x55   : > { %v206_v36 = vmul.f32 %v312_v27, %v205_v33  ;;  %v217_v37 = vmul.f32 %v327_v34, %v198_v26 }
  0x57   : > { %v207_v38 = vadd.f32 0.00021858087, %v206_v36  ;;  %v219_v39 = vsel %vm218_vm0, %v198_v26, %v217_v37 }
  0x58   : > { %v222_v40 = vsel %vm220_vm1, %v221_v35, %v219_v39 }
  0x59   : > { %v313_v41 = vadd.f32 -3.0, %v222_v40  ;;  %v208_v42 = vmul.f32 %v312_v27, %v207_v38 }
  0x5b   : > { %v224_v43 = vmul.f32 -0.00020021426, %v313_v41  ;;  %v209_v45 = vadd.f32 -0.001253725, %v208_v42 }
  0x5d   : > { %v225_v44 = vadd.f32 0.00010095056, %v224_v43  ;;  %v210_v48 = vmul.f32 %v312_v27, %v209_v45 }
  0x5f   : > { %v226_v46 = vmul.f32 %v313_v41, %v225_v44  ;;  %v211_v51 = vadd.f32 -0.0041776816, %v210_v48 }
  0x61   : > { %v227_v47 = vadd.f32 0.0013493432, %v226_v46  ;;  %v212_v54 = vmul.f32 %v312_v27, %v211_v51 }
  0x63   : > { %v228_v49 = vmul.f32 %v313_v41, %v227_v47  ;;  %v213_v57 = vadd.f32 0.24664073, %v212_v54 }
  0x65   : > { %v229_v50 = vadd.f32 -0.0036734284, %v228_v49  ;;  %v214_v60 = vmul.f32 %v312_v27, %v213_v57 }
  0x67   : > { %v230_v52 = vmul.f32 %v313_v41, %v229_v50  ;;  %v215_v63 = vadd.f32 1.5014094, %v214_v60 }
  0x69   : > { %v231_v53 = vadd.f32 0.0057395077, %v230_v52 }
  0x6b   : > { %v232_v55 = vmul.f32 %v313_v41, %v231_v53 }
  0x6d   : > { %v233_v56 = vadd.f32 -0.0076224613, %v232_v55 }
  0x6f   : > { %v234_v58 = vmul.f32 %v313_v41, %v233_v56 }
  0x71   : > { %v235_v59 = vadd.f32 0.0094388705, %v234_v58 }
  0x73   : > { %v236_v61 = vmul.f32 %v313_v41, %v235_v59 }
  0x75   : > { %v237_v62 = vadd.f32 1.001674, %v236_v61 }
  0x77   : > { %v238_v0 = vmul.f32 %v313_v41, %v237_v62 }
  0x79   : > { %v239_v1 = vadd.f32 2.8329768, %v238_v0 }
  0x7b   : > { %v241_v2 = vsel %vm240_vm2, %v215_v63, %v239_v1 }
  0x7c   : > { %v242_v3 = vmul.f32 %v311_v20, %v241_v2 }
  0x7e   : > { %v243_v5 = vmul.f32 1.4142135, %v242_v3 }
  0x80   : > { %v247_v7 = vmul.f32 %v246_v4, %v243_v5 }
  0x82   : > { %v248_v8 = vadd.f32 %v247_v7, %v245_v6 }
  0x84   : > { %249 = vst [vmem:[%s167_s26] sm:$0xff] %v248_v8 }
  0x85 PF: > { %s15_s16 = sadd.s32 1, %s334_s16  }
  0x86   : > { %p12_p4 = scmp.ge.s32.totalorder %s15_s16, 4  }
  0x88   :  { %14 = sbr.rel (!%p12_p4) target bundleno = 3 (0x3), region = 62 }

</bundles_post_ra>
